<compile_context>
chip_gen: v7x
topology: tpu7x:2x2x1
jax: 0.10.0
libtpu: 0.0.40
codegen_flags: <defaults>
</compile_context>

<pallas_src>
import math
from functools import partial

import jax
import jax.numpy as jnp
from jax import lax
from jax.experimental import pallas as pl
from jax.experimental.pallas import tpu as pltpu


def _flash_attn_kernel(q_ref, k_ref, v_ref, o_ref, m_ref, l_ref, acc_ref, *, scale):
    # q_ref: (1, 1, tL, E), k_ref: (1, 1, tS, E), v_ref: (1, 1, tS, D)
    # o_ref: (1, 1, tL, D)
    # m_ref/l_ref: (tL, 1) f32 scratch, acc_ref: (tL, D) f32 scratch
    s_idx = pl.program_id(3)

    @pl.when(s_idx == 0)
    def _init():
        m_ref[...] = jnp.full(m_ref.shape, -jnp.inf, dtype=jnp.float32)
        l_ref[...] = jnp.zeros(l_ref.shape, dtype=jnp.float32)
        acc_ref[...] = jnp.zeros(acc_ref.shape, dtype=jnp.float32)

    # Fold the softmax scale into the small (tL, E) q tile rather than the
    # (tL, tS) score matrix: tS/E x fewer VALU multiplies per S step.
    q = q_ref[0, 0] * scale        # (tL, E), compute dtype (bf16 fast path)
    k = k_ref[0, 0]                # (tS, E)
    v = v_ref[0, 0]                # (tS, D)

    # scores = (scale*q) @ k^T without materializing a transpose:
    # contract the E axis of both operands; accumulate in f32 on the MXU.
    scores = lax.dot_general(
        q, k,
        dimension_numbers=(((1,), (1,)), ((), ())),
        preferred_element_type=jnp.float32,
    )                                                       # (tL, tS) f32

    # Online (running) softmax update.
    m_prev = m_ref[...]                                     # (tL, 1)
    m_new = jnp.maximum(m_prev, jnp.max(scores, axis=-1, keepdims=True))
    alpha = jnp.exp(m_prev - m_new)                         # rescale factor
    p = jnp.exp(scores - m_new)                             # (tL, tS) f32

    l_ref[...] = alpha * l_ref[...] + jnp.sum(p, axis=-1, keepdims=True)
    acc_ref[...] = alpha * acc_ref[...] + jnp.dot(
        p.astype(v.dtype), v, preferred_element_type=jnp.float32)
    m_ref[...] = m_new

    # TODO(synk): nn.Dropout(0.1) is identity in eval mode; training-time
    # dropout would need pltpu.prng_seed / prng_random_bits applied to `p`.

    @pl.when(s_idx == pl.num_programs(3) - 1)
    def _finalize():
        l = l_ref[...]
        inv_l = pl.reciprocal(l, approx=True)        # EUP (free slot)
        inv_l = inv_l * (2.0 - l * inv_l)            # one Newton step -> ~f32 exact
        o_ref[0, 0] = (acc_ref[...] * inv_l).astype(o_ref.dtype)


def _pick_tile(dim, target, align):
    """Largest divisor of `dim` that is <= target and a multiple of `align`
    (falls back to multiples of 8, then the full dimension)."""
    if dim <= target:
        return dim
    for a in (align, 8):
        if a > target:
            continue
        cand = (target // a) * a
        while cand >= a:
            if dim % cand == 0:
                return cand
            cand -= a
    # TODO(synk): awkward non-divisible dims fall back to a single untiled block;
    # a cdiv grid + in-kernel masking would bound VMEM for those cases.
    return dim


def full_attention(queries, keys, values, scale=None, *,
                   q_tile=512, kv_tile=256, compute_dtype=jnp.bfloat16):
    """queries: (B, L, H, E), keys: (B, S, H, E), values: (B, S, H, D) -> (B, L, H, D)."""
    B, L, H, E = queries.shape
    _, S, _, D = values.shape
    scale = scale if scale is not None else 1.0 / math.sqrt(E)
    out_dtype = queries.dtype

    # bf16 MXU path: cast inputs, keep f32 accumulation inside the kernel.
    if compute_dtype is not None:
        queries = queries.astype(compute_dtype)
        keys = keys.astype(compute_dtype)
        values = values.astype(compute_dtype)

    align = 16 if jnp.dtype(queries.dtype).itemsize < 4 else 8   # sublane packing
    tL = _pick_tile(L, q_tile, align)
    tS = _pick_tile(S, kv_tile, align)

    # Head axis next to batch so each grid point sees dense 2-D tiles.  These
    # transposes are fused into the pallas_call operands via allow_input_fusion
    # (no standalone HBM round trip).
    q = jnp.transpose(queries, (0, 2, 1, 3))   # (B, H, L, E)
    k = jnp.transpose(keys,    (0, 2, 1, 3))   # (B, H, S, E)
    v = jnp.transpose(values,  (0, 2, 1, 3))   # (B, H, S, D)

    grid = (B, H, L // tL, S // tS)

    out = pl.pallas_call(
        partial(_flash_attn_kernel, scale=scale),
        out_shape=jax.ShapeDtypeStruct((B, H, L, D), out_dtype),
        grid_spec=pltpu.PrefetchScalarGridSpec(
            num_scalar_prefetch=0,
            grid=grid,
            in_specs=[
                pl.BlockSpec((1, 1, tL, E), lambda b, h, l, s: (b, h, l, 0)),
                pl.BlockSpec((1, 1, tS, E), lambda b, h, l, s: (b, h, s, 0)),
                pl.BlockSpec((1, 1, tS, D), lambda b, h, l, s: (b, h, s, 0)),
            ],
            out_specs=pl.BlockSpec((1, 1, tL, D), lambda b, h, l, s: (b, h, l, 0)),
            scratch_shapes=[
                pltpu.VMEM((tL, 1), jnp.float32),   # running max m
                pltpu.VMEM((tL, 1), jnp.float32),   # running denom l
                pltpu.VMEM((tL, D), jnp.float32),   # unnormalized accumulator
            ],
        ),
        compiler_params=pltpu.CompilerParams(
            dimension_semantics=("parallel", "parallel", "parallel", "arbitrary"),
            allow_input_fusion=[True, True, True],
        ),
    )(q, k, v)

    # TODO(synk): the PyTorch module also stashes the softmax matrix in
    # self.attention_weights; the flash formulation never materializes it.
    return jnp.transpose(out, (0, 2, 1, 3))    # (B, L, H, D)


def _reference(queries, keys, values, scale=None):
    E = queries.shape[-1]
    scale = scale if scale is not None else 1.0 / math.sqrt(E)
    q = queries.astype(jnp.float32)
    k = keys.astype(jnp.float32)
    v = values.astype(jnp.float32)
    scores = jnp.einsum('blhe,bshe->bhls', q, k)
    a = jax.nn.softmax(scale * scores, axis=-1)
    return jnp.einsum('bhls,bshd->blhd', a, v).astype(queries.dtype)


if __name__ == "__main__":
    key = jax.random.PRNGKey(0)

    # Small test, same shapes as the PyTorch module's typical usage.
    kq, kk, kv, key = jax.random.split(key, 4)
    B, L, S, H, E, D = 2, 8, 8, 2, 32, 32
    queries = jax.random.normal(kq, (B, L, H, E), dtype=jnp.float32)
    keys = jax.random.normal(kk, (B, S, H, E), dtype=jnp.float32)
    values = jax.random.normal(kv, (B, S, H, D), dtype=jnp.float32)

    out = full_attention(queries, keys, values)
    jax.block_until_ready(out)
    ref = _reference(queries, keys, values)
    assert out.shape == (B, L, H, D)
    assert out.dtype == queries.dtype
    # bf16 compute path: tolerances sized for bf16 Q/K/V with f32 accumulation.
    assert jnp.allclose(out, ref, atol=3e-2, rtol=3e-2), float(jnp.max(jnp.abs(out - ref)))

    # Larger test exercising the multi-block flash path: tL=512, tS=256 ->
    # grid (1, 2, 1, 4), two parallel grid steps for the v7x megacore.
    kq, kk, kv, key = jax.random.split(key, 4)
    B2, L2, S2, H2, E2, D2 = 1, 512, 1024, 2, 64, 64
    q2 = jax.random.normal(kq, (B2, L2, H2, E2), dtype=jnp.float32)
    k2 = jax.random.normal(kk, (B2, S2, H2, E2), dtype=jnp.float32)
    v2 = jax.random.normal(kv, (B2, S2, H2, D2), dtype=jnp.float32)

    out2 = full_attention(q2, k2, v2)
    jax.block_until_ready(out2)
    ref2 = _reference(q2, k2, v2)
    assert out2.shape == (B2, L2, H2, D2)
    assert jnp.allclose(out2, ref2, atol=3e-2, rtol=3e-2), float(jnp.max(jnp.abs(out2 - ref2)))

    print("KERNEL_OK")
</pallas_src>

<mosaic_0001>
module attributes {stable_mosaic.version = 11 : i64} {
  func.func @_flash_attn_kernel(%arg0: i32, %arg1: i32, %arg2: i32, %arg3: i32, %arg4: memref<1x1x8x32xbf16, #tpu.memory_space<vmem>>, %arg5: memref<1x1x8x32xbf16, #tpu.memory_space<vmem>>, %arg6: memref<1x1x8x32xbf16, #tpu.memory_space<vmem>>, %arg7: memref<1x1x8x32xf32, #tpu.memory_space<vmem>>, %arg8: memref<8x1xf32, #tpu.memory_space<vmem>>, %arg9: memref<8x1xf32, #tpu.memory_space<vmem>>, %arg10: memref<8x32xf32, #tpu.memory_space<vmem>>) attributes {dimension_semantics = [#tpu.dimension_semantics<parallel>, #tpu.dimension_semantics<parallel>, #tpu.dimension_semantics<parallel>, #tpu.dimension_semantics<arbitrary>], iteration_bounds = array<i64: 2, 2, 1, 1>, scalar_prefetch = 0 : i64, scratch_operands = 3 : i64, tpu.core_type = #tpu.core_type<tc>, window_params = [{transform_indices = @transform_0, window_bounds = array<i64: 1, 1, 8, 32>}, {transform_indices = @transform_1, window_bounds = array<i64: 1, 1, 8, 32>}, {transform_indices = @transform_2, window_bounds = array<i64: 1, 1, 8, 32>}, {transform_indices = @transform_3, window_bounds = array<i64: 1, 1, 8, 32>}]} {
    %c0_i32 = arith.constant 0 : i32
    %0 = arith.cmpi eq, %arg3, %c0_i32 : i32
    %1 = arith.extui %0 : i1 to i32
    %c0_i32_0 = arith.constant 0 : i32
    %2 = arith.cmpi ne, %1, %c0_i32_0 : i32
    scf.if %2 {
      %cst_30 = arith.constant 0xFF800000 : f32
      %38 = vector.broadcast %cst_30 : f32 to vector<8x1xf32>
      %c0_31 = arith.constant 0 : index
      %c0_32 = arith.constant 0 : index
      %39 = vector.load %arg8[%c0_31, %c0_32] : memref<8x1xf32, #tpu.memory_space<vmem>>, vector<8x1xf32>
      tpu.vector_store %arg8[%c0_31, %c0_32], %38 {strides = array<i32>} : memref<8x1xf32, #tpu.memory_space<vmem>>, vector<8x1xf32>,
      %cst_33 = arith.constant 0.000000e+00 : f32
      %40 = vector.broadcast %cst_33 : f32 to vector<8x1xf32>
      %c0_34 = arith.constant 0 : index
      %c0_35 = arith.constant 0 : index
      %41 = vector.load %arg9[%c0_34, %c0_35] : memref<8x1xf32, #tpu.memory_space<vmem>>, vector<8x1xf32>
      tpu.vector_store %arg9[%c0_34, %c0_35], %40 {strides = array<i32>} : memref<8x1xf32, #tpu.memory_space<vmem>>, vector<8x1xf32>,
      %cst_36 = arith.constant 0.000000e+00 : f32
      %42 = vector.broadcast %cst_36 : f32 to vector<8x32xf32>
      %c0_37 = arith.constant 0 : index
      %c0_38 = arith.constant 0 : index
      %43 = vector.load %arg10[%c0_37, %c0_38] : memref<8x32xf32, #tpu.memory_space<vmem>>, vector<8x32xf32>
      tpu.vector_store %arg10[%c0_37, %c0_38], %42 {strides = array<i32>} : memref<8x32xf32, #tpu.memory_space<vmem>>, vector<8x32xf32>,
    } else {
    }
    %c0 = arith.constant 0 : index
    %c0_1 = arith.constant 0 : index
    %c0_2 = arith.constant 0 : index
    %c0_3 = arith.constant 0 : index
    %3 = vector.load %arg4[%c0, %c0_1, %c0_2, %c0_3] : memref<1x1x8x32xbf16, #tpu.memory_space<vmem>>, vector<1x1x8x32xbf16>
    %4 = vector.shape_cast %3 : vector<1x1x8x32xbf16> to vector<8x32xbf16>
    %cst = arith.constant 1.767580e-01 : bf16
    %5 = vector.broadcast %cst : bf16 to vector<8x32xbf16>
    %6 = arith.mulf %4, %5 : vector<8x32xbf16>
    %c0_4 = arith.constant 0 : index
    %c0_5 = arith.constant 0 : index
    %c0_6 = arith.constant 0 : index
    %c0_7 = arith.constant 0 : index
    %7 = vector.load %arg5[%c0_4, %c0_5, %c0_6, %c0_7] : memref<1x1x8x32xbf16, #tpu.memory_space<vmem>>, vector<1x1x8x32xbf16>
    %8 = vector.shape_cast %7 : vector<1x1x8x32xbf16> to vector<8x32xbf16>
    %c0_8 = arith.constant 0 : index
    %c0_9 = arith.constant 0 : index
    %c0_10 = arith.constant 0 : index
    %c0_11 = arith.constant 0 : index
    %9 = vector.load %arg6[%c0_8, %c0_9, %c0_10, %c0_11] : memref<1x1x8x32xbf16, #tpu.memory_space<vmem>>, vector<1x1x8x32xbf16>
    %10 = vector.shape_cast %9 : vector<1x1x8x32xbf16> to vector<8x32xbf16>
    %cst_12 = arith.constant dense<0.000000e+00> : vector<8x8xf32>
    %11 = tpu.matmul %6, %8, %cst_12 {dimension_numbers = #tpu.dot_dimension_numbers<[1], [1], [0], [0], [0, 0, 1, 0], [], []>} : vector<8x32xbf16>, vector<8x32xbf16>, vector<8x8xf32> -> vector<8x8xf32>
    %c0_13 = arith.constant 0 : index
    %c0_14 = arith.constant 0 : index
    %12 = vector.load %arg8[%c0_13, %c0_14] : memref<8x1xf32, #tpu.memory_space<vmem>>, vector<8x1xf32>
    %cst_15 = arith.constant dense<0xFF800000> : vector<8xf32>
    %13 = vector.multi_reduction <maximumf>, %11, %cst_15 [1] : vector<8x8xf32> to vector<8xf32>
    %14 = vector.shape_cast %13 : vector<8xf32> to vector<8x1xf32>
    %15 = arith.maximumf %12, %14 : vector<8x1xf32>
    %16 = arith.subf %12, %15 : vector<8x1xf32>
    %17 = math.exp %16 : vector<8x1xf32>
    %18 = vector.broadcast %15 : vector<8x1xf32> to vector<8x8xf32>
    %19 = arith.subf %11, %18 : vector<8x8xf32>
    %20 = math.exp %19 : vector<8x8xf32>
    %c0_16 = arith.constant 0 : index
    %c0_17 = arith.constant 0 : index
    %21 = vector.load %arg9[%c0_16, %c0_17] : memref<8x1xf32, #tpu.memory_space<vmem>>, vector<8x1xf32>
    %22 = arith.mulf %17, %21 : vector<8x1xf32>
    %cst_18 = arith.constant dense<0.000000e+00> : vector<8xf32>
    %23 = vector.multi_reduction <add>, %20, %cst_18 [1] : vector<8x8xf32> to vector<8xf32>
    %24 = vector.shape_cast %23 : vector<8xf32> to vector<8x1xf32>
    %25 = arith.addf %22, %24 : vector<8x1xf32>
    %c0_19 = arith.constant 0 : index
    %c0_20 = arith.constant 0 : index
    %26 = vector.load %arg9[%c0_19, %c0_20] : memref<8x1xf32, #tpu.memory_space<vmem>>, vector<8x1xf32>
    tpu.vector_store %arg9[%c0_19, %c0_20], %25 {strides = array<i32>} : memref<8x1xf32, #tpu.memory_space<vmem>>, vector<8x1xf32>,
    %c0_21 = arith.constant 0 : index
    %c0_22 = arith.constant 0 : index
    %27 = vector.load %arg10[%c0_21, %c0_22] : memref<8x32xf32, #tpu.memory_space<vmem>>, vector<8x32xf32>
    %28 = vector.broadcast %17 : vector<8x1xf32> to vector<8x32xf32>
    %29 = arith.mulf %28, %27 : vector<8x32xf32>
    %30 = arith.truncf %20 : vector<8x8xf32> to vector<8x8xbf16>
    %cst_23 = arith.constant dense<0.000000e+00> : vector<8x32xf32>
    %31 = tpu.matmul %30, %10, %cst_23 {dimension_numbers = #tpu.dot_dimension_numbers<[1], [0], [0], [1], [0, 0, 1, 1], [], []>} : vector<8x8xbf16>, vector<8x32xbf16>, vector<8x32xf32> -> vector<8x32xf32>
    %32 = arith.addf %29, %31 : vector<8x32xf32>
    %c0_24 = arith.constant 0 : index
    %c0_25 = arith.constant 0 : index
    %33 = vector.load %arg10[%c0_24, %c0_25] : memref<8x32xf32, #tpu.memory_space<vmem>>, vector<8x32xf32>
    tpu.vector_store %arg10[%c0_24, %c0_25], %32 {strides = array<i32>} : memref<8x32xf32, #tpu.memory_space<vmem>>, vector<8x32xf32>,
    %c0_26 = arith.constant 0 : index
    %c0_27 = arith.constant 0 : index
    %34 = vector.load %arg8[%c0_26, %c0_27] : memref<8x1xf32, #tpu.memory_space<vmem>>, vector<8x1xf32>
    tpu.vector_store %arg8[%c0_26, %c0_27], %15 {strides = array<i32>} : memref<8x1xf32, #tpu.memory_space<vmem>>, vector<8x1xf32>,
    %c0_i32_28 = arith.constant 0 : i32
    %35 = arith.cmpi eq, %arg3, %c0_i32_28 : i32
    %36 = arith.extui %35 : i1 to i32
    %c0_i32_29 = arith.constant 0 : i32
    %37 = arith.cmpi ne, %36, %c0_i32_29 : i32
    scf.if %37 {
      %c0_30 = arith.constant 0 : index
      %c0_31 = arith.constant 0 : index
      %38 = vector.load %arg9[%c0_30, %c0_31] : memref<8x1xf32, #tpu.memory_space<vmem>>, vector<8x1xf32>
      %39 = tpu.reciprocal %38 {approx = true} : vector<8x1xf32> -> vector<8x1xf32>
      %40 = arith.mulf %38, %39 : vector<8x1xf32>
      %cst_32 = arith.constant 2.000000e+00 : f32
      %41 = vector.broadcast %cst_32 : f32 to vector<8x1xf32>
      %42 = arith.subf %41, %40 : vector<8x1xf32>
      %43 = arith.mulf %39, %42 : vector<8x1xf32>
      %c0_33 = arith.constant 0 : index
      %c0_34 = arith.constant 0 : index
      %44 = vector.load %arg10[%c0_33, %c0_34] : memref<8x32xf32, #tpu.memory_space<vmem>>, vector<8x32xf32>
      %45 = vector.broadcast %43 : vector<8x1xf32> to vector<8x32xf32>
      %46 = arith.mulf %44, %45 : vector<8x32xf32>
      %c0_35 = arith.constant 0 : index
      %c0_36 = arith.constant 0 : index
      %c0_37 = arith.constant 0 : index
      %c0_38 = arith.constant 0 : index
      %47 = vector.load %arg7[%c0_35, %c0_36, %c0_37, %c0_38] : memref<1x1x8x32xf32, #tpu.memory_space<vmem>>, vector<1x1x8x32xf32>
      %48 = vector.shape_cast %47 : vector<1x1x8x32xf32> to vector<8x32xf32>
      %49 = vector.shape_cast %46 : vector<8x32xf32> to vector<1x1x8x32xf32>
      tpu.vector_store %arg7[%c0_35, %c0_36, %c0_37, %c0_38], %49 {strides = array<i32>} : memref<1x1x8x32xf32, #tpu.memory_space<vmem>>, vector<1x1x8x32xf32>,
    } else {
    }
    return
  }
  func.func @transform_0(%arg0: i32, %arg1: i32, %arg2: i32, %arg3: i32) -> (i32, i32, i32, i32) {
    %c0_i32 = arith.constant 0 : i32
    %c0_i32_0 = arith.constant 0 : i32
    return %arg0, %arg1, %arg2, %c0_i32 : i32, i32, i32, i32
  }
  func.func @transform_1(%arg0: i32, %arg1: i32, %arg2: i32, %arg3: i32) -> (i32, i32, i32, i32) {
    %c0_i32 = arith.constant 0 : i32
    %c0_i32_0 = arith.constant 0 : i32
    return %arg0, %arg1, %arg3, %c0_i32 : i32, i32, i32, i32
  }
  func.func @transform_2(%arg0: i32, %arg1: i32, %arg2: i32, %arg3: i32) -> (i32, i32, i32, i32) {
    %c0_i32 = arith.constant 0 : i32
    %c0_i32_0 = arith.constant 0 : i32
    return %arg0, %arg1, %arg3, %c0_i32 : i32, i32, i32, i32
  }
  func.func @transform_3(%arg0: i32, %arg1: i32, %arg2: i32, %arg3: i32) -> (i32, i32, i32, i32) {
    %c0_i32 = arith.constant 0 : i32
    %c0_i32_0 = arith.constant 0 : i32
    return %arg0, %arg1, %arg2, %c0_i32 : i32, i32, i32, i32
  }
}

</mosaic_0001>

<bundles_post_ra>
// kernel: tpu_custom_call.1
= control target key start
LH: loop header
LB: loop body
LE: loop exit
PB: predicated region body
PF: predicated region fallthrough
CT: control target
= control target key end

     0   :  { %s1289_s0 = inlined_call_operand.hbm [shape: bf16[2,2,8,32], index: 0, kind: input, shape index: {}]   ;;  %s1290_s1 = inlined_call_operand.hbm [shape: bf16[2,2,8,32], index: 1, kind: input, shape index: {}]   ;;  %s1291_s2 = inlined_call_operand.hbm [shape: bf16[2,2,8,32], index: 2, kind: input, shape index: {}]   ;;  %s1292_s3 = inlined_call_operand.hbm [shape: f32[2,2,8,32], index: 3, kind: output, shape index: {}]  }
   0x1   :  { %1302 = sst [smem:[#allocation21_spill]] %s1290_s1 }
   0x2   :  { %8 = vsyncpa [#allocation6], 0 }
   0x3   :  { %10 = vsyncpa [#allocation6 + $0x1], 0 }
   0x4   :  { %11 = vsyncpa [#allocation9], 0 }
   0x5   :  { %13 = vsyncpa [#allocation9 + $0x1], 0 }
   0x6   :  { %14 = vsyncpa [#allocation7], 0 }
   0x7   :  { %16 = vsyncpa [#allocation7 + $0x1], 0  ;;  %s991_s12 = smov 0   ;;  %s993_s13 = smov 0  }
   0x8   :  { %s995_s14 = smov 0   ;;  %s997_s15 = smov 0  }
   0x9   :  { %s999_s16 = smov 0   ;;  %s1001_s17 = smov 0  }
   0xa   :  { %s1003_s18 = smov 0   ;;  %s1005_s19 = smov 0  }
   0xb LB: > { %1303 = sst [smem:[#allocation15_spill]] %s953_s17  ;;  %s1032_s20 = sadd.s32 4294967295, %s961_s19   ;;  %s961_s19 = sphi %s1005_s19, %s22_s19   ;;  %s957_s18 = sphi %s1003_s18, %s1330_s18   ;;  %s953_s17 = sphi %s1001_s17, %s1329_s17   ;;  %s949_s16 = sphi %s999_s16, %s1328_s16   ;;  %s945_s15 = sphi %s997_s15, %s1327_s15   ;;  %s941_s14 = sphi %s995_s14, %s1333_s14   ;;  %s937_s13 = sphi %s993_s13, %s1332_s13   ;;  %s933_s12 = sphi %s991_s12, %s1331_s12  }
   0xc   : > { %1304 = sst [smem:[#allocation16_spill]] %s957_s18  ;;  %s629_s21 = sadd.s32 4294967294, %s961_s19  }
   0xd   : > { %s44_s22 = sadd.s32 1, %s953_s17  ;;  %s48_s23 = sadd.s32 1, %s957_s18 }
   0xe   : > { %p46_p0 = scmp.ge.s32.totalorder %s44_s22, 2  ;;  %s59_s24 = sadd.s32 1, %s941_s14 }
   0xf   : > { %p66_p1 = scmp.ne.s32.totalorder %s941_s14, %s937_s13  ;;  %p67_p2 = scmp.eq.s32.totalorder %s961_s19, 0 }
  0x10   : > { %s1335_s22 = smov (%p46_p0, %s44_s22), 0  ;;  %s1337_s23 = smov (!%p46_p0, %s48_s23), %s957_s18 }
  0x11   : > { %1305 = sst [smem:[#allocation17_spill]] %s1335_s22  ;;  %s53_s25 = ssub.s32 %s953_s17, %s1335_s22 }
  0x12   : > { %p1046_p3 = por %p67_p2, %p66_p1  ;;  %p50_p4 = scmp.ge.s32.totalorder %s1337_s23, 2 }
  0x13   : > { %p72_p5 = scmp.ne.s32.totalorder %s937_s13, %s933_s12  ;;  %p73_p6 = scmp.eq.s32.totalorder %s1032_s20, 0 }
  0x14   : > { %p160_p7 = scmp.eq.s32.totalorder %s1032_s20, 3  ;;  %s1339_s23 = smov (%p50_p4, %s1337_s23), 0 }
  0x15   : > { %1307 = sst [smem:[#allocation18_spill]] %s1339_s23  ;;  %p1056_p8 = por %p73_p6, %p72_p5 }
  0x16   : > { %p1060_p9 = por %p160_p7, %p66_p1  ;;  %s52_s29 = ssub.s32 %s957_s18, %s1339_s23 }
  0x17   : > { %s1308_s27 = scalar_select %p1056_p8, 1, 0 }
  0x18   : > { %s1309_s28 = scalar_select %p1060_p9, 1, 0 }
  0x19   : > { %p166_p10 = scmp.eq.s32.totalorder %s629_s21, 3  ;;  %s54_s30 = sor.u32 %s53_s25, %s52_s29 }
  0x1a   : > { %p57_p11 = scmp.eq.s32.totalorder %s54_s30, 0  ;;  %p691_p13 = scmp.lt.s32.totalorder %s961_s19, 4 }
  0x1b   : > { %p1066_p12 = por %p166_p10, %p72_p5  ;;  %s1293_s5 = sand.u32 1, %s941_s14  }
  0x1c   : > { %s1073_s6 = scalar_select %p57_p11, %s941_s14, %s59_s24  }
  0x1d   : > { %s1310_s4 = scalar_select %p1066_p12, 1, 0 }
  0x1e   : > { %1312 = sst [smem:[#allocation20_spill]] %s1073_s6  ;;  %s1077_s7 = sshll.u32 %s1293_s5, 2 }
  0x1f   : > { %1311 = sst [smem:[#allocation19_spill]] %s1310_s4  ;;  %s633_s8 = sshll.u32 %s957_s18, 1 }
  0x20   : > { %s196_s9 = sadd.s32 %s953_s17, %s633_s8  ;;  %p1083_p0 = pnand %p691_p13, %p1046_p3 }
  0x21   : > { %s1087_s11 = sshll.u32 %s196_s9, 6  ;;  %s207_s21 = sand.u32 1, %s961_s19  }
  0x22   : > { %s1313_s10 = scalar_select %p1083_p0, 1, 0 }
  0x23   : > { %s1314_s1 = sld [smem:[#allocation21_spill]]  ;;  %s211_s30 = scalar_lea.vmem [#allocation8], %s1077_s7 }
  0x24   : > { %s221_s26 = sshll.u32 %s211_s30, 4  ;;  %s1101_s8 = scalar_lea.sflag [#allocation9], %s207_s21  ;;  %s1098_s26 = int_to_ptr.vmem [resolvable:$true] %s221_s26 }
  0x25   : > { %p1107_p4 = pneg %p1083_p0 }
  0x29   : > { %s1094_s24 = scalar_lea.hbm %s1314_s1, %s1087_s11  ;;  %s774_s30 = scalar_lea.hbm %s1314_s1, 256 }
  0x2a   : > { %s769_s9 = scalar_lea.hbm %s1094_s24, 64  ;;  %p775_p7 = scmp.lt.u32.totalorder %s1094_s24, %s1314_s1 }
  0x2b   : > { %p770_p3 = scmp.ne.s32.totalorder %s1094_s24, %s769_s9  ;;  %p776_p10 = scmp.lt.u32.totalorder %s774_s30, %s769_s9 }
  0x2c   : > { %p778_p13 = scmp.lt.u32.totalorder %s769_s9, %s1094_s24 }
  0x2d   : > { %p772_p5 = pnand %p1107_p4, %p770_p3  ;;  %p777_p11 = por %p776_p10, %p775_p7 }
  0x2f   : > { %p773_p6 = pneg %p772_p5  ;;  %p779_p1 = por %p778_p13, %p777_p11 }
  0x31   : > { %p780_p2 = pnand %p779_p1, %p773_p6 }
  0x33   : > { %783 = shalt.err (!%p780_p2)
}
  0x34   : > { %s784_s21 = scalar_lea.vmem %s1098_s26, 64  ;;  %s963_s25 = smov [#allocation8]  }
  0x35   : > { %p785_p3 = scmp.ne.s32.totalorder %s1098_s26, %s784_s21  ;;  %s789_s29 = sshll.u32 %s963_s25, 4  ;;  %s790_s29 = int_to_ptr.vmem [resolvable:$false] %s789_s29 }
  0x36   : > { %s791_s22 = scalar_lea.vmem %s790_s29, 128  ;;  %p792_p9 = scmp.lt.s32.totalorder %s1098_s26, %s790_s29 }
  0x37   : > { %p787_p5 = pnand %p785_p3, %p1107_p4  ;;  %p793_p8 = scmp.lt.s32.totalorder %s791_s22, %s784_s21 }
  0x39   : > { %p788_p12 = pneg %p787_p5  ;;  %p794_p7 = por %p793_p8, %p792_p9 }
  0x3b   : > { %p795_p10 = pnand %p794_p7, %p788_p12 }
  0x3d   : > { %798 = shalt.err (!%p795_p10)
}
  0x3e   : > { %683 = dma.hbm_to_vmem [thread:$0]  (!%p1083_p0), %s1094_s24, 64, %s1098_s26, %s1101_s8  }
  0x3f   : > { %p1316_p1 = scmp.lt.s32.totalorder %s961_s19, 5  ;;  %p1317_p2 = scmp.ge.s32.totalorder %s961_s19, 1 }
  0x40   : > { %s1143_s21 = scalar_lea.hbm %s1289_s0, %s1087_s11  ;;  %s190_s25 = scalar_lea.vmem [#allocation5], %s1077_s7 }
  0x41   : > { %p1135_p6 = pnand %p1317_p2, %p1316_p1  ;;  %s200_s29 = sshll.u32 %s190_s25, 4  ;;  %s1146_s29 = int_to_ptr.vmem [resolvable:$true] %s200_s29 }
  0x42   : > { %s1152_s22 = scalar_lea.hbm %s1291_s2, %s1087_s11  ;;  %s1319_s1 = sand.u32 1, %s941_s14  }
  0x43   : > { %s1318_s23 = scalar_select %p1135_p6, 1, 0 }
  0x44   : > { %s187_s18 = scalar_lea.sflag [#allocation6], %s1319_s1  ;;  %s799_s17 = scalar_lea.hbm %s1143_s21, 64 }
  0x45   : > { %p800_p8 = scmp.ne.s32.totalorder %s1143_s21, %s799_s17  ;;  %s804_s6 = scalar_lea.hbm %s1289_s0, 256 }
  0x46   : > { %p805_p11 = scmp.lt.u32.totalorder %s1143_s21, %s1289_s0  ;;  %p806_p13 = scmp.lt.u32.totalorder %s804_s6, %s799_s17 }
  0x47   : > { %p802_p9 = pnand %p800_p8, %p1107_p4  ;;  %p808_p5 = scmp.lt.u32.totalorder %s799_s17, %s1143_s21 }
  0x48   : > { %p807_p3 = por %p806_p13, %p805_p11 }
  0x49   : > { %p803_p12 = pneg %p802_p9 }
  0x4a   : > { %p809_p7 = por %p808_p5, %p807_p3 }
  0x4c   : > { %p810_p10 = pnand %p809_p7, %p803_p12 }
  0x4e   : > { %813 = shalt.err (!%p810_p10)
}
  0x4f   : > { %s814_s1 = scalar_lea.vmem %s1146_s29, 64  ;;  %s964_s11 = smov [#allocation5]  }
  0x50   : > { %p815_p1 = scmp.ne.s32.totalorder %s1146_s29, %s814_s1  ;;  %s819_s24 = sshll.u32 %s964_s11, 4  ;;  %s820_s24 = int_to_ptr.vmem [resolvable:$false] %s819_s24 }
  0x51   : > { %s821_s4 = scalar_lea.vmem %s820_s24, 128  ;;  %p822_p9 = scmp.lt.s32.totalorder %s1146_s29, %s820_s24 }
  0x52   : > { %p817_p2 = pnand %p815_p1, %p1107_p4  ;;  %p823_p6 = scmp.lt.s32.totalorder %s821_s4, %s814_s1 }
  0x54   : > { %p818_p8 = pneg %p817_p2  ;;  %p824_p11 = por %p823_p6, %p822_p9 }
  0x56   : > { %p825_p13 = pnand %p824_p11, %p818_p8 }
  0x58   : > { %828 = shalt.err (!%p825_p13)
}
  0x59   : > { %680 = dma.hbm_to_vmem [thread:$0]  (!%p1083_p0), %s1143_s21, 64, %s1146_s29, %s187_s18  }
  0x5a   : > { %s232_s17 = scalar_lea.vmem [#allocation10], %s1077_s7  ;;  %s829_s26 = scalar_lea.hbm %s1152_s22, 64 }
  0x5b   : > { %s242_s6 = sshll.u32 %s232_s17, 4  ;;  %p830_p12 = scmp.ne.s32.totalorder %s1152_s22, %s829_s26  ;;  %s243_s6 = int_to_ptr.vmem [resolvable:$true] %s242_s6 }
  0x5c   : > { %s834_s25 = scalar_lea.hbm %s1291_s2, 256  ;;  %p835_p5 = scmp.lt.u32.totalorder %s1152_s22, %s1291_s2 }
  0x5d   : > { %p832_p6 = pnand %p830_p12, %p1107_p4  ;;  %p836_p7 = scmp.lt.u32.totalorder %s834_s25, %s829_s26 }
  0x5e   : > { %p838_p1 = scmp.lt.u32.totalorder %s829_s26, %s1152_s22 }
  0x5f   : > { %p833_p3 = pneg %p832_p6  ;;  %p837_p10 = por %p836_p7, %p835_p5 }
  0x61   : > { %p839_p2 = por %p838_p1, %p837_p10 }
  0x63   : > { %p840_p8 = pnand %p839_p2, %p833_p3 }
  0x65   : > { %843 = shalt.err (!%p840_p8)
}
  0x66   : > { %s844_s18 = scalar_lea.vmem %s243_s6, 64  ;;  %s965_s7 = smov [#allocation10]  }
  0x67   : > { %p845_p9 = scmp.ne.s32.totalorder %s243_s6, %s844_s18  ;;  %s849_s21 = sshll.u32 %s965_s7, 4  ;;  %s850_s21 = int_to_ptr.vmem [resolvable:$false] %s849_s21 }
  0x68   : > { %s851_s29 = scalar_lea.vmem %s850_s21, 128  ;;  %p852_p12 = scmp.lt.s32.totalorder %s243_s6, %s850_s21 }
  0x69   : > { %p847_p11 = pnand %p845_p9, %p1107_p4  ;;  %p853_p6 = scmp.lt.s32.totalorder %s851_s29, %s844_s18 }
  0x6b   : > { %p848_p13 = pneg %p847_p11  ;;  %p854_p0 = por %p853_p6, %p852_p12 }
  0x6d   : > { %p855_p5 = pnand %p854_p0, %p848_p13 }
  0x6f   : > { %858 = shalt.err (!%p855_p5)
}
  0x70   : > { %p1320_p7 = scmp.ne.s32.totalorder %s1313_s10, 0  ;;  %p1321_p3 = scmp.ne.s32.totalorder %s1318_s23, 0 }
  0x71   : > { %s1199_s5 = sand.u32 (!%p1321_p3), 1, %s937_s13   ;;  %p1322_p0 = scmp.ne.s32.totalorder (!%p1321_p3), %s1308_s27, 0 }
  0x72   : > { %686 = dma.hbm_to_vmem [thread:$0]  (!%p1320_p7), %s1152_s22, 64, %s243_s6, %s1101_s8  }
  0x73   : > { %251 = sbr.rel (%p1321_p3) target bundleno = 950 (0x3b6), region = 32  ;;  %s1202_s24 = sshll.u32 (!%p1321_p3), %s1199_s5, 2 }
  0x74   : > { %s254_s4 = scalar_lea.sflag (!%p1321_p3), [#allocation6], %s1199_s5  ;;  %s257_s17 = scalar_lea.vmem (!%p1321_p3), [#allocation5], %s1202_s24 }
  0x7a   : > { %920 = dma.done.wait (%p1322_p0), %s254_s4, 64  }
  0x7b   : > { %922 = vsyncadd (%p1322_p0), %s254_s4, 4294967232  ;;  %s262_s10 = sand.u32 1, %s1032_s20   ;;  %s266_s23 = scalar_lea.vmem [#allocation8], %s1202_s24 }
  0x7c   : > { %s263_s8 = scalar_lea.sflag [#allocation9], %s262_s10 }
  0x7d   : > { %924 = dma.done.wait (%p1322_p0), %s263_s8, 128  }
  0x7e   : > { %926 = vsyncadd (%p1322_p0), %s263_s8, 4294967168  ;;  %vm317_vm0 = vcmask 261120   ;;  %v966_v0 = vmov 0.0   ;;  %vm967_vm1 = vmmov 0   ;;  %v321_v1 = vld [vmem:[%s266_s23] sm:$0xf] }
  0x7f   : > { %657 = vmatprep.subr.bf16.mxu0 %v966_v0  ;;  %318 = vst.msk [vmem:[#allocation4] sm:$0xff] %vm317_vm0, %v966_v0  ;;  %659 = vmatprep.mubr.msk.bf16.mxu0 %vm967_vm1, %v966_v0  ;;  %v328_v2 = vsel %vm317_vm0, %v321_v1, 0  ;;  %v319_v3 = vld [vmem:[%s257_s17] sm:$0xf]  ;;  %vm314_vm2 = vcmask 7168   ;;  %v968_v5 = vmov -inf  }
  0x80   : > { %663 = vmatprep.subr.bf16.mxu1 %v966_v0  ;;  %665 = vmatprep.mubr.msk.bf16.mxu1 %vm967_vm1, %v966_v0  ;;  %v320_v4 = vmul.bf16 1043676725, %v319_v3  ;;  %315 = vst.msk [vmem:[#allocation2] sm:$0xff] %vm314_vm2, %v968_v5  ;;  %316 = vst.msk [vmem:[#allocation3] sm:$0xff] %vm314_vm2, %v966_v0  ;;  %vm371_vm3 = vcmask 64512   ;;  %v969_v11 = vmov 0  }
  0x81   : > { %658 = vmatpush3.bf16.xpose.msra.mxu0 %v328_v2  ;;  %761 = vset.pattern.permute.xlu0 %v969_v11  ;;  %vm406_vm4 = vcmask 1043456   ;;  %s275_s20 = scalar_lea.vmem [#allocation10], %s1202_s24  ;;  %s645_s27 = sshll.u32 %s1199_s5, 3 }
  0x82   : > { %762 = vset.pattern.permute.xlu1 %v969_v11  ;;  %v322_v16 = vld [vmem:[%s275_s20] sm:$0xf]  ;;  %s649_s22 = sshll.u32 %s949_s16, 1  ;;  %s307_s9 = scalar_lea.vmem [#allocation11], %s645_s27 }
  0x83   : > { %v408_v17 = vsel %vm406_vm4, %v322_v16, 0  ;;  %s482_s6 = sadd.s32 %s945_s15, %s649_s22  ;;  %s486_s30 = sshll.u32 %s307_s9, 4  ;;  %s1236_s30 = int_to_ptr.vmem [resolvable:$true] %s486_s30 }
  0x84   : > { %664 = vmatpush3.bf16.msra.mxu1 %v408_v17  ;;  %s650_s26 = sshll.u32 %s482_s6, 7  ;;  %s470_s16 = scalar_lea.sflag [#allocation7], %s1199_s5 }
  0x85   : > { %s1234_s11 = scalar_lea.hbm %s1292_s3, %s650_s26  ;;  %s859_s15 = scalar_lea.vmem %s1236_s30, 128 }
  0x86   : > { %v395_v35 = vld [vmem:[#allocation4] sm:$0xff]  ;;  %p860_p4 = scmp.ne.s32.totalorder %s1236_s30, %s859_s15  ;;  %p1323_p10 = scmp.ne.s32.totalorder %s1309_s28, 0 }
  0x87   : > { %v370_v12 = vld [vmem:[#allocation2] sm:$0xff]  ;;  %v387_v26 = vld [vmem:[#allocation3] sm:$0xff]  ;;  %s970_s18 = smov [#allocation11]  }
  0x88   : > { %660 = vmatmul.mubr.msk.bf16.vlgmr.msra.gmra.mrb[0].mxu0 %vm317_vm0, %v320_v4  ;;  %p861_p1 = pnand %p860_p4, %p1323_p10  ;;  %s863_s7 = sshll.u32 %s970_s18, 4  ;;  %s864_s7 = int_to_ptr.vmem [resolvable:$false] %s863_s7 }
  0x89   : > { %s865_s21 = scalar_lea.vmem %s864_s7, 256  ;;  %p866_p8 = scmp.lt.s32.totalorder %s1236_s30, %s864_s7 }
  0x8a   : > { %p862_p2 = pneg %p861_p1  ;;  %p867_p9 = scmp.lt.s32.totalorder %s865_s21, %s859_s15 }
  0x8c   : > { %p868_p11 = por %p867_p9, %p866_p8 }
  0x8e   : > { %p869_p13 = pnand %p868_p11, %p862_p2 }
 0x15b   : > { %v364_v6 = vpop.f32.mrb[0].mxu0 }
 0x15c   : > { %v661_v7 = vpop.f32.mrb[1].mxu0  ;;  %v372_v8 = vsel %vm371_vm3, %v364_v6, -inf }
 0x15d   : > { %373 = vmax.xlane.f32.xlu0 %v372_v8  ;;  %v367_v9 = vpop.f32.mrb[2].mxu0 }
 0x15e   : > { %v662_v10 = vpop.f32.mrb[3].mxu0 }
 0x1ea   : > { %v374_v13 = vpop.xlane.xlu0 %373 }
 0x1eb   : > { %v375_v14 = vmax.f32 %v370_v12, %v374_v13 }
 0x1ed   : > { %v376_v15 = vsub.f32 %v370_v12, %v375_v14  ;;  %452 = vst.msk [vmem:[#allocation2] sm:$0xff] %vm314_vm2, %v375_v14  ;;  %381 = vperm.xlu0 %761, %v375_v14  }
 0x1ef   : > { %v377_v24 = vmul.f32 1.442695, %v376_v15 }
 0x26c   : > { %v382_v18 = vpop.permute.xlu0 %381 }
 0x26d   : > { %v384_v19 = vsub.f32 %v364_v6, %v382_v18 }
 0x26f   : > { %v385_v20 = vmul.f32 1.442695, %v384_v19 }
 0x271   : > { %763 = vpow2.f32 %v385_v20 }
 0x272   : > { %765 = vpow2.f32 %v377_v24 }
 0x27b   : > { %v764_v21 = vpop.eup %763 }
 0x27c   : > { %v389_v22 = vsel %vm371_vm3, %v764_v21, 0.0  ;;  %v402_v23 = vpack.c.bf16 %v764_v21, %v764_v21  ;;  %v766_v25 = vpop.eup %765 }
 0x27d   : > { %390 = vadd.xlane.f32.xlu1 %v389_v22  ;;  %v388_v27 = vmul.f32 %v766_v25, %v387_v26 }
 0x27e   : > { %666 = vmatmul.mubr.msk.bf16.vlgmr.msra.gmra.mrb[0].mxu1 %vm371_vm3, %v402_v23 }
 0x28e   : > { %398 = vperm.xlu1 %762, %v766_v25  }
 0x30a   : > { %v391_v28 = vpop.xlane.xlu1 %390 }
 0x30b   : > { %v392_v29 = vadd.f32 %v391_v28, %v388_v27 }
 0x30d   : > { %394 = vst.msk [vmem:[#allocation3] sm:$0xff] %vm314_vm2, %v392_v29 }
 0x30e   : > { %v399_v36 = vpop.permute.xlu1 %398 }
 0x30f   : > { %v401_v37 = vmul.f32 %v399_v36, %v395_v35 }
 0x314   : > { %v456_v30 = vld [vmem:[#allocation3] sm:$0xff] }
 0x315   : > { %767 = vrcp.f32 %v456_v30 }
 0x31f   : > { %v768_v31 = vpop.eup %767 }
 0x320   : > { %v458_v32 = vmul.f32 %v768_v31, %v456_v30 }
 0x322   : > { %v459_v33 = vsub.f32 2.0, %v458_v32 }
 0x324   : > { %v460_v34 = vmul.f32 %v768_v31, %v459_v33 }
 0x326   : > { %464 = vperm.xlu1 %762, %v460_v34  }
 0x351   : > { %v444_v38 = vpop.f32.mrb[0].mxu1 }
 0x352   : > { %v450_v39 = vadd.f32 %v444_v38, %v401_v37  ;;  %v667_v40 = vpop.f32.mrb[1].mxu1 }
 0x353   : > { %v447_v41 = vpop.f32.mrb[2].mxu1 }
 0x354   : > { %451 = vst.msk [vmem:[#allocation4] sm:$0xff] %vm317_vm0, %v450_v39  ;;  %v668_v42 = vpop.f32.mrb[3].mxu1 }
 0x35b   : > { %v461_v43 = vld [vmem:[#allocation4] sm:$0xff] }
 0x3a5   : > { %v465_v44 = vpop.permute.xlu1 %464 }
 0x3a6   : > { %v467_v45 = vmul.f32 %v465_v44, %v461_v43 }
 0x3a8   : > { %468 = vst.msk [vmem:[%s307_s9] sm:$0xff] %vm317_vm0, %v467_v45 }
 0x3a9   : > { %872 = shalt.err (!%p869_p13)
}
 0x3aa   : > { %s873_s29 = scalar_lea.hbm %s1234_s11, 128  ;;  %s877_s4 = scalar_lea.hbm %s1292_s3, 512 }
 0x3ab   : > { %p874_p12 = scmp.ne.s32.totalorder %s1234_s11, %s873_s29  ;;  %p878_p7 = scmp.lt.u32.totalorder %s1234_s11, %s1292_s3 }
 0x3ac   : > { %p879_p3 = scmp.lt.u32.totalorder %s877_s4, %s873_s29  ;;  %p881_p4 = scmp.lt.u32.totalorder %s873_s29, %s1234_s11 }
 0x3ad   : > { %p875_p6 = pnand %p874_p12, %p1323_p10 }
 0x3ae   : > { %p880_p0 = por %p879_p3, %p878_p7 }
 0x3af   : > { %p876_p5 = pneg %p875_p6 }
 0x3b0   : > { %p882_p1 = por %p881_p4, %p880_p0 }
 0x3b2   : > { %p883_p2 = pnand %p882_p1, %p876_p5 }
 0x3b4   : > { %886 = shalt.err (!%p883_p2)
}
 0x3b5   : > { %675 = dma.vmem_to_hbm [thread:$0]  (%p1323_p10), %s1236_s30, 128, %s1234_s11, %s470_s16  }
 0x3b6 PF: > { %s1324_s8 = sld [smem:[#allocation19_spill]]  ;;  %p692_p8 = scmp.ge.s32.totalorder %s961_s19, 2 }
 0x3b7   : > { %s498_s23 = sand.u32 1, %s933_s12  }
 0x3b8   : > { %s499_s20 = scalar_lea.sflag [#allocation7], %s498_s23 }
 0x3bc   : > { %p1325_p9 = scmp.ne.s32.totalorder %s1324_s8, 0 }
 0x3be   : > { %p688_p11 = pnand %p692_p8, %p1325_p9 }
 0x3c0   : > { %928 = dma.done.wait (!%p688_p11), %s499_s20, 128  }
 0x3c1   : > { %930 = vsyncadd (!%p688_p11), %s499_s20, 4294967168  ;;  %s22_s19 = sadd.s32 1, %s961_s19   ;;  %s1326_s28 = sld [smem:[#allocation20_spill]] }
 0x3c2   : > { %p19_p13 = scmp.ge.s32.totalorder %s22_s19, 6   ;;  %s1327_s15 = sld [smem:[#allocation15_spill]] }
 0x3c3   : > { %s1328_s16 = sld [smem:[#allocation16_spill]]  ;;  %s1329_s17 = sld [smem:[#allocation17_spill]] }
 0x3c4   : > { %s1330_s18 = sld [smem:[#allocation18_spill]]  ;;  %s1331_s12 = smov %s937_s13 }
 0x3c5   : > { %s1332_s13 = smov %s941_s14  ;;  %21 = sbr.rel (!%p19_p13) target bundleno = 11 (0xb), region = 109 }
 0x3c7   : > { %s1333_s14 = smov %s1326_s28 }
 0x3cc   :  { %504 = vsyncpa [#allocation6], 1 }
 0x3cd   :  { %506 = vsyncpa [#allocation6 + $0x1], 1 }
 0x3ce   :  { %507 = vsyncpa [#allocation9], 1 }
 0x3cf   :  { %509 = vsyncpa [#allocation9 + $0x1], 1 }
 0x3d0   :  { %510 = vsyncpa [#allocation7], 1 }
 0x3d1   :  { %512 = vsyncpa [#allocation7 + $0x1], 1 }

</bundles_post_ra>
